<compile_context>
chip_gen: v6e
topology: v6e:2x2x1
jax: 0.10.0
libtpu: 0.0.40
codegen_flags: <defaults>
</compile_context>

<pallas_src>
import jax
import jax.numpy as jnp
from jax.experimental import pallas as pl
from jax.experimental.pallas import tpu as pltpu
from jax.scipy.special import erf as _erf_exact


TARGET_BLOCK_BYTES = 2 << 20          # ~2 MiB per block buffer (2-4 MiB plateau,
                                      # low end keeps v7x / f32-temporaries headroom)
_VMEM_LIMIT_BYTES = 32 << 20          # explicit scoped-VMEM request (needed on v5e)
_SUBLANE_MIN = {4: 8, 2: 16, 1: 32}   # min sublane multiple per itemsize
_WIDTH_CANDIDATES = (4096, 2048, 1024, 512, 256, 128)

_INV_SQRT2 = 0.7071067811865476


# ----------------------------- math (shared) -----------------------------

def _gelu_erf(x, recip):
    """Exact-erf GELU via A&S 7.1.26, folded using erf's odd symmetry.

        gelu(x) = 0.5*x*(1 + erf(x/sqrt2))
                = 0.5*x + (1/sqrt2) * a * E(a),   a = |x|/sqrt2,
        E(a)    = 1 - poly(t)*exp(-a^2),          t = 1/(1 + 0.3275911*a)

    No sign compare / select / negate needed; exp argument is -a^2 <= 0 so it
    never overflows.  `recip` is 1/v (exact outside the kernel, EUP approx
    inside).
    """
    a = jnp.abs(x) * _INV_SQRT2
    t = recip(1.0 + 0.3275911 * a)
    poly = t * (0.254829592 + t * (-0.284496736 + t * (1.421413741
            + t * (-1.453152027 + t * 1.061405429))))
    e = 1.0 - poly * jnp.exp(-a * a)
    return 0.5 * x + _INV_SQRT2 * (a * e)


def _comp_math(x, recip=lambda v: 1.0 / v):
    """x**2 + x + x*tanh(gelu(x)) + cos(x), computed in float32."""
    g = _gelu_erf(x, recip)
    a1 = x * x + x
    a2 = x * jnp.tanh(g)
    a3 = jnp.cos(x)
    return a1 + a2 + a3


# ------------------------------- kernel ----------------------------------

def _comp_kernel(x_ref, o_ref):
    x = x_ref[...].astype(jnp.float32)
    out = _comp_math(x, recip=lambda v: pl.reciprocal(v, approx=True))
    o_ref[...] = out.astype(o_ref.dtype)


# ------------------------------- wrapper ----------------------------------

def comp_forward(x, *, min_pallas_elems=16384):
    """Elementwise `comp` forward, matching the PyTorch reference semantics."""
    n = x.size
    if n == 0:
        return x
    dtype = x.dtype
    if n < min_pallas_elems or n < 128:
        # Tiny tensors: fixed Pallas launch overhead dwarfs the work.
        return _comp_math(x.astype(jnp.float32)).astype(dtype)

    orig_shape = x.shape
    itemsize = jnp.dtype(dtype).itemsize
    sub_min = _SUBLANE_MIN.get(itemsize, 8)

    flat = x.reshape(-1)
    n_main = (n // 128) * 128      # lane-aligned prefix handled by Pallas
    tail = n - n_main              # < 128 leftover elements (rare) -> pure JAX

    main = flat if tail == 0 else flat[:n_main]

    # Widest lane-dense slab width that divides the main element count.
    W = 128
    for cand in _WIDTH_CANDIDATES:
        if n_main % cand == 0:
            W = cand
            break
    rows = n_main // W
    slab = main.reshape(rows, W)

    # Rows per grid step: ~TARGET_BLOCK_BYTES per block, sublane aligned.
    br_target = TARGET_BLOCK_BYTES // (W * itemsize)
    br_target = max(sub_min, (br_target // sub_min) * sub_min)

    if rows <= br_target:
        if rows >= 2 * sub_min:
            # Force >= 2 grid steps so the "parallel" axis can shard across
            # both TensorCores on v7x (neutral on v5e/v6e).
            half = -(-rows // 2)
            br = -(-half // sub_min) * sub_min
        else:
            br = rows              # single block == full array dims (legal)
    else:
        br = br_target             # partial last block; Pallas masks OOB stores
        # Prefer an evenly-dividing block (no masked partial last step), as
        # long as it does not shrink blocks below ~half the target size.
        cand = br_target
        lo = max(sub_min, br_target // 2)
        while cand >= lo:
            if rows % cand == 0:
                br = cand
                break
            cand -= sub_min

    grid = (pl.cdiv(rows, br),)

    out = pl.pallas_call(
        _comp_kernel,
        out_shape=jax.ShapeDtypeStruct((rows, W), dtype),
        grid_spec=pltpu.PrefetchScalarGridSpec(
            num_scalar_prefetch=0,
            grid=grid,
            in_specs=[pl.BlockSpec((br, W), lambda i: (i, 0))],
            out_specs=pl.BlockSpec((br, W), lambda i: (i, 0)),
        ),
        compiler_params=pltpu.CompilerParams(
            # Parallel grid axis -> Mosaic may shard the loop across both
            # TensorCores on v7x; harmless on v5e/v6e.
            dimension_semantics=("parallel",),
            vmem_limit_bytes=_VMEM_LIMIT_BYTES,
        ),
    )(slab)

    out_flat = out.reshape(-1)
    if tail:
        # Only the sub-128-element tail goes through the pure-JAX path.
        tail_out = _comp_math(flat[n_main:].astype(jnp.float32)).astype(dtype)
        out_flat = jnp.concatenate([out_flat, tail_out])
    return out_flat.reshape(orig_shape)


# ------------------------------ reference ---------------------------------

def _reference(x):
    """Pure-JAX reference using the exact erf GELU (matches torch F.gelu default)."""
    xf = x.astype(jnp.float32)
    g = 0.5 * xf * (1.0 + _erf_exact(xf * _INV_SQRT2))
    res = xf * xf + xf + xf * jnp.tanh(g) + jnp.cos(xf)
    return res.astype(x.dtype)


if __name__ == "__main__":
    key = jax.random.PRNGKey(0)
    k1, k2, k3 = jax.random.split(key, 3)

    # Small NCHW input consistent with the module -- forced through the Pallas path
    # (2048 elems -> single (1, 2048) lane-dense block).
    x_small = jax.random.normal(k1, (2, 4, 16, 16), dtype=jnp.float32) * 2.0
    y_small = comp_forward(x_small, min_pallas_elems=0)
    jax.block_until_ready(y_small)
    assert y_small.shape == x_small.shape and y_small.dtype == x_small.dtype
    assert jnp.allclose(y_small, _reference(x_small), atol=2e-3, rtol=1e-3)

    # Larger input exercising the multi-step pipelined grid
    # (4 MiB of f32 -> (256, 4096) slab -> 2 blocks of 2 MiB, grid=(2,)).
    x_big = jax.random.normal(k2, (8, 32, 64, 64), dtype=jnp.float32) * 2.0
    y_big = comp_forward(x_big)
    jax.block_until_ready(y_big)
    assert y_big.shape == x_big.shape and y_big.dtype == x_big.dtype
    assert jnp.allclose(y_big, _reference(x_big), atol=2e-3, rtol=1e-3)

    # Ragged size (not a multiple of 128): Pallas handles the 1152-element
    # aligned prefix, the 3-element tail goes through the pure-JAX fallback.
    x_odd = jax.random.normal(k3, (3, 5, 7, 11), dtype=jnp.float32) * 2.0
    y_odd = comp_forward(x_odd, min_pallas_elems=0)
    jax.block_until_ready(y_odd)
    assert y_odd.shape == x_odd.shape and y_odd.dtype == x_odd.dtype
    assert jnp.allclose(y_odd, _reference(x_odd), atol=2e-3, rtol=1e-3)

    print("KERNEL_OK")
</pallas_src>

<mosaic_0001>
module attributes {stable_mosaic.version = 11 : i64} {
  func.func @_comp_kernel(%arg0: i32, %arg1: memref<1x2048xf32, #tpu.memory_space<vmem>>, %arg2: memref<1x2048xf32, #tpu.memory_space<vmem>>) attributes {dimension_semantics = [#tpu.dimension_semantics<parallel>], iteration_bounds = array<i64: 1>, scalar_prefetch = 0 : i64, scratch_operands = 0 : i64, tpu.core_type = #tpu.core_type<tc>, window_params = [{transform_indices = @transform_0, window_bounds = array<i64: 1, 2048>}, {transform_indices = @transform_1, window_bounds = array<i64: 1, 2048>}]} {
    %c0 = arith.constant 0 : index
    %c0_0 = arith.constant 0 : index
    %0 = vector.load %arg1[%c0, %c0_0] : memref<1x2048xf32, #tpu.memory_space<vmem>>, vector<1x2048xf32>
    %1 = math.absf %0 : vector<1x2048xf32>
    %cst = arith.constant 0.707106769 : f32
    %2 = vector.broadcast %cst : f32 to vector<1x2048xf32>
    %3 = arith.mulf %1, %2 : vector<1x2048xf32>
    %cst_1 = arith.constant 0.327591091 : f32
    %4 = vector.broadcast %cst_1 : f32 to vector<1x2048xf32>
    %5 = arith.mulf %4, %3 : vector<1x2048xf32>
    %cst_2 = arith.constant 1.000000e+00 : f32
    %6 = vector.broadcast %cst_2 : f32 to vector<1x2048xf32>
    %7 = arith.addf %6, %5 : vector<1x2048xf32>
    %8 = tpu.reciprocal %7 {approx = true} : vector<1x2048xf32> -> vector<1x2048xf32>
    %cst_3 = arith.constant 1.06140542 : f32
    %9 = vector.broadcast %cst_3 : f32 to vector<1x2048xf32>
    %10 = arith.mulf %8, %9 : vector<1x2048xf32>
    %cst_4 = arith.constant -1.45315206 : f32
    %11 = vector.broadcast %cst_4 : f32 to vector<1x2048xf32>
    %12 = arith.addf %11, %10 : vector<1x2048xf32>
    %13 = arith.mulf %8, %12 : vector<1x2048xf32>
    %cst_5 = arith.constant 1.42141378 : f32
    %14 = vector.broadcast %cst_5 : f32 to vector<1x2048xf32>
    %15 = arith.addf %14, %13 : vector<1x2048xf32>
    %16 = arith.mulf %8, %15 : vector<1x2048xf32>
    %cst_6 = arith.constant -0.284496725 : f32
    %17 = vector.broadcast %cst_6 : f32 to vector<1x2048xf32>
    %18 = arith.addf %17, %16 : vector<1x2048xf32>
    %19 = arith.mulf %8, %18 : vector<1x2048xf32>
    %cst_7 = arith.constant 0.254829586 : f32
    %20 = vector.broadcast %cst_7 : f32 to vector<1x2048xf32>
    %21 = arith.addf %20, %19 : vector<1x2048xf32>
    %22 = arith.mulf %8, %21 : vector<1x2048xf32>
    %cst_8 = arith.constant 0.000000e+00 : f32
    %23 = vector.broadcast %cst_8 : f32 to vector<1x2048xf32>
    %24 = arith.subf %23, %3 : vector<1x2048xf32>
    %25 = arith.mulf %24, %3 : vector<1x2048xf32>
    %26 = math.exp %25 : vector<1x2048xf32>
    %27 = arith.mulf %22, %26 : vector<1x2048xf32>
    %cst_9 = arith.constant 1.000000e+00 : f32
    %28 = vector.broadcast %cst_9 : f32 to vector<1x2048xf32>
    %29 = arith.subf %28, %27 : vector<1x2048xf32>
    %cst_10 = arith.constant 5.000000e-01 : f32
    %30 = vector.broadcast %cst_10 : f32 to vector<1x2048xf32>
    %31 = arith.mulf %30, %0 : vector<1x2048xf32>
    %32 = arith.mulf %3, %29 : vector<1x2048xf32>
    %cst_11 = arith.constant 0.707106769 : f32
    %33 = vector.broadcast %cst_11 : f32 to vector<1x2048xf32>
    %34 = arith.mulf %33, %32 : vector<1x2048xf32>
    %35 = arith.addf %31, %34 : vector<1x2048xf32>
    %36 = arith.mulf %0, %0 : vector<1x2048xf32>
    %37 = arith.addf %36, %0 : vector<1x2048xf32>
    %38 = math.tanh %35 : vector<1x2048xf32>
    %39 = arith.mulf %0, %38 : vector<1x2048xf32>
    %40 = math.cos %0 : vector<1x2048xf32>
    %41 = arith.addf %37, %39 : vector<1x2048xf32>
    %42 = arith.addf %41, %40 : vector<1x2048xf32>
    %c0_12 = arith.constant 0 : index
    %c0_13 = arith.constant 0 : index
    %43 = vector.load %arg2[%c0_12, %c0_13] : memref<1x2048xf32, #tpu.memory_space<vmem>>, vector<1x2048xf32>
    tpu.vector_store %arg2[%c0_12, %c0_13], %42 {strides = array<i32>} : memref<1x2048xf32, #tpu.memory_space<vmem>>, vector<1x2048xf32>,
    return
  }
  func.func @transform_0(%arg0: i32) -> (i32, i32) {
    %c0_i32 = arith.constant 0 : i32
    %c0_i32_0 = arith.constant 0 : i32
    return %arg0, %c0_i32 : i32, i32
  }
  func.func @transform_1(%arg0: i32) -> (i32, i32) {
    %c0_i32 = arith.constant 0 : i32
    %c0_i32_0 = arith.constant 0 : i32
    return %arg0, %c0_i32 : i32, i32
  }
}

</mosaic_0001>

<bundles_post_ra>
// kernel: tpu_custom_call.1
= control target key start
LH: loop header
LB: loop body
LE: loop exit
PB: predicated region body
PF: predicated region fallthrough
CT: control target
= control target key end

     0   :  { %6 = vsyncpa [#allocation3], 0  ;;  %s577_s0 = inlined_call_operand.hbm [shape: f32[1,2048], index: 0, kind: input, shape index: {}]   ;;  %s578_s1 = inlined_call_operand.hbm [shape: f32[1,2048], index: 1, kind: output, shape index: {}]  }
   0x1   :  { %7 = vsyncpa [#allocation4], 0  ;;  %s394_s6 = smov [#allocation2]  }
   0x2   :  { %s14_s7 = sshll.u32 %s394_s6, 4  ;;  %s15_s7 = int_to_ptr.vmem [resolvable:$true] %s14_s7 }
   0x3   :  { %s358_s8 = scalar_lea.vmem %s15_s7, 256  ;;  %p363_p1 = scmp.lt.s32.totalorder %s15_s7, %s15_s7 }
   0x4   :  { %p359_p0 = scmp.ne.s32.totalorder %s15_s7, %s358_s8  ;;  %p364_p2 = scmp.lt.s32.totalorder %s358_s8, %s358_s8 }
   0x6   :  { %p365_p3 = por %p364_p2, %p363_p1 }
   0x8   :  { %p366_p4 = pnand %p365_p3, %p359_p0 }
   0xa   :  { %369 = shalt.err (!%p366_p4)
}
   0xb   :  { %17 = dma.hbm_to_vmem [thread:$0]  %s577_s0, 256, %s15_s7, [#allocation3]  }
   0xc   :  { %390 = dma.done.wait [#allocation3], 256  }
   0xd   :  { %391 = vsyncadd [#allocation3], 4294967040  ;;  %v415_v0 = vld [vmem:[#allocation2] sm:$0xff]  ;;  %v417_v1 = vld [vmem:[#allocation2 + $0x8] sm:$0xff]  ;;  %v395_v25 = vmov 683565275  }
   0xe   :  { %v420_v2 = vand.u32 2147483647, %v415_v0  ;;  %v423_v3 = vand.u32 2147483647, %v417_v1  ;;  %v82_v4 = vand.u32 2139095040, %v415_v0  ;;  %v185_v15 = vand.u32 2139095040, %v417_v1 }
   0xf   :  { %v396_v27 = vmov 2475754826   ;;  %v397_v29 = vmov 2131351028   ;;  %v398_v31 = vmov 2102212464  }
  0x10   :  { %v427_v5 = vmul.f32 0.70710677, %v420_v2  ;;  %v430_v6 = vmul.f32 0.70710677, %v423_v3  ;;  %v83_v7 = vshrl.u32 %v82_v4, 23  ;;  %v186_v17 = vshrl.u32 %v185_v15, 23 }
  0x11   :  { %v86_v13 = vand.u32 8388607, %v420_v2  ;;  %v399_v33 = vmov 920167782   ;;  %v189_v36 = vand.u32 8388607, %v423_v3 }
  0x12   :  { %v27_v8 = vmul.f32 0.3275911, %v427_v5  ;;  %v28_v9 = vmul.f32 0.3275911, %v430_v6  ;;  %v306_v10 = vadd.s32 4294967169, %v83_v7  ;;  %v51_v16 = vsub.f32 0.0, %v427_v5 }
  0x13   :  { %v87_v18 = vor.u32 8388608, %v86_v13  ;;  %v310_v23 = vadd.s32 4294967169, %v186_v17  ;;  %v400_v42 = vmov 1326507024   ;;  %vm81_vm13 = vcmp.lt.s32.totalorder %v415_v0, 0  ;;  %s401_s0 = smov [#allocation5]  }
  0x14   :  { %v29_v11 = vadd.f32 1.0, %v27_v8  ;;  %v30_v12 = vadd.f32 1.0, %v28_v9  ;;  %v89_v14 = vadd.s32 1, %v306_v10  ;;  %v53_v21 = vmul.f32 %v51_v16, %v427_v5  ;;  %s297_s11 = sshll.u32 %s401_s0, 4  ;;  %s298_s11 = int_to_ptr.vmem [resolvable:$true] %s297_s11 }
  0x15   :  { %v443_v35 = vshll.u32 %v87_v18, 8  ;;  %v192_v47 = vadd.s32 1, %v310_v23  ;;  %v190_v8 = vor.u32 8388608, %v189_v36  ;;  %v52_v18 = vsub.f32 0.0, %v430_v6  ;;  %s370_s12 = scalar_lea.vmem %s298_s11, 256  ;;  %p375_p6 = scmp.lt.s32.totalorder %s298_s11, %s298_s11 }
  0x16   :  { %330 = vrcp.f32 %v29_v11  ;;  %vm90_vm0 = vcmp.gt.s32.totalorder %v89_v14, 0  ;;  %v55_v58 = vmul.f32 1.442695, %v53_v21  ;;  %vm80_vm14 = vcmp.le.f32.partialorder %v420_v2, 0.7853982  ;;  %p371_p5 = scmp.ne.s32.totalorder %s298_s11, %s370_s12  ;;  %p376_p7 = scmp.lt.s32.totalorder %s370_s12, %s370_s12 }
  0x17   :  { %332 = vrcp.f32 %v30_v12  ;;  %v91_v19 = vsel %vm90_vm0, %v89_v14, 0  ;;  %vm193_vm5 = vcmp.gt.s32.totalorder %v192_v47, 0  ;;  %v481_v36 = vshll.u32 %v190_v8, 8 }
  0x18   :  { %v93_v20 = vand.u32 31, %v91_v19  ;;  %v92_v22 = vshrl.u32 %v91_v19, 5  ;;  %v194_v61 = vsel %vm193_vm5, %v192_v47, 0  ;;  %334 = vpow2.f32 %v55_v58  ;;  %p377_p8 = por %p376_p7, %p375_p6 }
  0x19   :  { %v196_v16 = vand.u32 31, %v194_v61  ;;  %v195_v19 = vshrl.u32 %v194_v61, 5  ;;  %vm184_vm0 = vcmp.lt.s32.totalorder %v417_v1, 0 }
  0x1a   :  { %v94_v24 = vsub.s32 32, %v93_v20  ;;  %v96_v26 = vshll.u32 %v395_v25, %v93_v20  ;;  %v99_v28 = vshll.u32 %v396_v27, %v93_v20  ;;  %v102_v30 = vshll.u32 %v397_v29, %v93_v20  ;;  %p378_p9 = pnand %p377_p8, %p371_p5 }
  0x1b   :  { %v105_v32 = vshll.u32 %v398_v31, %v93_v20  ;;  %v108_v34 = vshll.u32 %v399_v33, %v93_v20  ;;  %vm111_vm1 = vcmp.lt.s32.totalorder %v92_v22, 1  ;;  %vm114_vm2 = vcmp.lt.s32.totalorder %v92_v22, 4 }
  0x1c   :  { %v95_v37 = vshrl.u32 %v395_v25, %v94_v24  ;;  %v97_v38 = vshrl.u32 %v396_v27, %v94_v24  ;;  %v100_v39 = vshrl.u32 %v397_v29, %v94_v24  ;;  %v103_v40 = vshrl.u32 %v398_v31, %v94_v24 }
  0x1d   :  { %v106_v41 = vshrl.u32 %v399_v33, %v94_v24  ;;  %v109_v43 = vshrl.u32 %v400_v42, %v94_v24  ;;  %vm112_vm3 = vcmp.lt.s32.totalorder %v92_v22, 2  ;;  %vm113_vm4 = vcmp.lt.s32.totalorder %v92_v22, 3 }
  0x1e   :  { %v98_v44 = vor.u32 %v97_v38, %v96_v26  ;;  %v101_v45 = vor.u32 %v100_v39, %v99_v28  ;;  %v104_v46 = vor.u32 %v103_v40, %v102_v30  ;;  %v197_v22 = vsub.s32 32, %v196_v16 }
  0x1f   :  { %v107_v48 = vor.u32 %v106_v41, %v105_v32  ;;  %v110_v49 = vor.u32 %v109_v43, %v108_v34  ;;  %v199_v23 = vshll.u32 %v395_v25, %v196_v16  ;;  %v202_v26 = vshll.u32 %v396_v27, %v196_v16 }
  0x20   :  { %v115_v50 = vsel %vm111_vm1, %v95_v37, %v98_v44  ;;  %v116_v51 = vsel %vm114_vm2, %v104_v46, 2102212464  ;;  %v119_v52 = vsel %vm111_vm1, %v98_v44, %v101_v45  ;;  %v123_v53 = vsel %vm111_vm1, %v101_v45, %v104_v46 }
  0x21   :  { %v117_v54 = vsel %vm113_vm4, %v101_v45, %v116_v51  ;;  %v120_v55 = vsel %vm114_vm2, %v107_v48, 920167782  ;;  %v124_v56 = vsel %vm114_vm2, %v110_v49, 1326507024  ;;  %v205_v28 = vshll.u32 %v397_v29, %v196_v16 }
  0x22   :  { %v121_v59 = vsel %vm113_vm4, %v104_v46, %v120_v55  ;;  %v125_v60 = vsel %vm113_vm4, %v107_v48, %v124_v56  ;;  %v118_v10 = vsel %vm112_vm3, %v115_v50, %v117_v54  ;;  %v200_v34 = vshrl.u32 %v396_v27, %v197_v22 }
  0x23   :  { %v452_v57 = vpop.eup %330  ;;  %v122_v4 = vsel %vm112_vm3, %v119_v52, %v121_v59  ;;  %v126_v7 = vsel %vm112_vm3, %v123_v53, %v125_v60  ;;  %v134_v21 = vmul.u32 %v443_v35, %v118_v10  ;;  %v206_v37 = vshrl.u32 %v398_v31, %v197_v22 }
  0x24   :  { %v454_v62 = vpop.eup %332  ;;  %v33_v63 = vmul.f32 1.0614054, %v452_v57  ;;  %v462_v11 = vmul.u32.u64.low %v443_v35, %v126_v7  ;;  %v463_v12 = vmul.u32.u64.high %v443_v35, %v126_v7, %v462_v11  ;;  %v208_v38 = vshll.u32 %v398_v31, %v196_v16 }
  0x25   :  { %v34_v9 = vmul.f32 1.0614054, %v454_v62  ;;  %v466_v14 = vmul.u32.u64.low %v443_v35, %v122_v4  ;;  %v467_v15 = vmul.u32.u64.high %v443_v35, %v122_v4, %v466_v14  ;;  %v203_v35 = vshrl.u32 %v397_v29, %v197_v22  ;;  %v335_v4 = vpop.eup %334 }
  0x26   :  { %v35_v13 = vadd.f32 -1.4531521, %v33_v63  ;;  %vm214_vm7 = vcmp.lt.s32.totalorder %v195_v19, 1  ;;  %v201_v41 = vor.u32 %v200_v34, %v199_v23  ;;  %v209_v43 = vshrl.u32 %v399_v33, %v197_v22 }
  0x27   :  { %v36_v17 = vadd.f32 -1.4531521, %v34_v9  ;;  %vm136_vm6 = vc.u32 %v463_v12, %v466_v14  ;;  %v137_v32 = vadd.s32 1, %v467_v15  ;;  %v204_v46 = vor.u32 %v203_v35, %v202_v26 }
  0x28   :  { %v37_v20 = vmul.f32 %v452_v57, %v35_v13  ;;  %v207_v27 = vor.u32 %v206_v37, %v205_v28  ;;  %v210_v48 = vor.u32 %v209_v43, %v208_v38  ;;  %v211_v29 = vshll.u32 %v399_v33, %v196_v16 }
  0x29   :  { %v38_v24 = vmul.f32 %v454_v62, %v36_v17  ;;  %v138_v40 = vsel %vm136_vm6, %v137_v32, %v467_v15  ;;  %v212_v49 = vshrl.u32 %v400_v42, %v197_v22  ;;  %v198_v31 = vshrl.u32 %v395_v25, %v197_v22 }
  0x2a   :  { %v39_v30 = vadd.f32 1.4214138, %v37_v20  ;;  %v139_v45 = vadd.s32 %v138_v40, %v134_v21  ;;  %vm216_vm8 = vcmp.lt.s32.totalorder %v195_v19, 3  ;;  %vm217_vm9 = vcmp.lt.s32.totalorder %v195_v19, 4 }
  0x2b   :  { %v40_v44 = vadd.f32 1.4214138, %v38_v24  ;;  %v213_v52 = vor.u32 %v212_v49, %v211_v29  ;;  %vm215_vm10 = vcmp.lt.s32.totalorder %v195_v19, 2  ;;  %v222_v53 = vsel %vm214_vm7, %v201_v41, %v204_v46 }
  0x2c   :  { %v41_v39 = vmul.f32 %v452_v57, %v39_v30  ;;  %v140_v50 = vadd.s32 536870912, %v139_v45  ;;  %v54_v54 = vmul.f32 %v52_v18, %v430_v6  ;;  %v219_v56 = vsel %vm217_vm9, %v207_v27, 2102212464 }
  0x2d   :  { %v223_v33 = vsel %vm217_vm9, %v210_v48, 920167782  ;;  %v42_v42 = vmul.f32 %v454_v62, %v40_v44  ;;  %v218_v60 = vsel %vm214_vm7, %v198_v31, %v201_v41  ;;  %v226_v63 = vsel %vm214_vm7, %v204_v46, %v207_v27 }
  0x2e   :  { %v43_v47 = vadd.f32 -0.28449672, %v41_v39  ;;  %v495_v55 = vshrl.u32 %v140_v50, 30  ;;  %v224_v25 = vsel %vm216_vm8, %v207_v27, %v223_v33  ;;  %v220_v7 = vsel %vm216_vm8, %v204_v46, %v219_v56 }
  0x2f   :  { %v225_v61 = vsel %vm215_vm10, %v222_v53, %v224_v25  ;;  %v227_v8 = vsel %vm217_vm9, %v213_v52, 1326507024  ;;  %v57_v13 = vmul.f32 1.442695, %v54_v54  ;;  %v221_v20 = vsel %vm215_vm10, %v218_v60, %v220_v7 }
  0x30   :  { %v45_v51 = vmul.f32 %v452_v57, %v43_v47  ;;  %v142_v59 = vshll.u32 %v495_v55, 30  ;;  %v508_v9 = vmul.u32.u64.low %v481_v36, %v225_v61  ;;  %v509_v10 = vmul.u32.u64.high %v481_v36, %v225_v61, %v508_v9 }
  0x31   :  { %v228_v16 = vsel %vm216_vm8, %v210_v48, %v227_v8  ;;  %v44_v21 = vadd.f32 -0.28449672, %v42_v42  ;;  %336 = vpow2.f32 %v57_v13  ;;  %v135_v38 = vadd.s32 %v466_v14, %v463_v12 }
  0x32   :  { %v47_v58 = vadd.f32 0.2548296, %v45_v51  ;;  %v143_v15 = vsub.s32 %v139_v45, %v142_v59  ;;  %v229_v17 = vsel %vm215_vm10, %v226_v63, %v228_v16  ;;  %v240_v28 = vadd.s32 1, %v509_v10 }
  0x33   :  { %v517_v22 = vmul.u32.u64.low %v481_v36, %v229_v17  ;;  %v518_v23 = vmul.u32.u64.high %v481_v36, %v229_v17, %v517_v22  ;;  %v46_v32 = vmul.f32 %v454_v62, %v44_v21  ;;  %v63_v48 = vmul.f32 0.5, %v415_v0 }
  0x34   :  { %v49_v11 = vmul.f32 %v452_v57, %v47_v58  ;;  %v145_v18 = vsub.s32 0, %v143_v15  ;;  %v237_v57 = vmul.u32 %v481_v36, %v221_v20  ;;  %v165_v63 = vsub.s32 4, %v495_v55 }
  0x35   :  { %vm239_vm11 = vc.u32 %v518_v23, %v508_v9  ;;  %v48_v39 = vadd.f32 0.2548296, %v46_v32  ;;  %v238_v7 = vadd.s32 %v508_v9, %v518_v23  ;;  %v64_v20 = vmul.f32 0.5, %v417_v1 }
  0x36   :  { %v59_v24 = vmul.f32 %v335_v4, %v49_v11  ;;  %v307_v26 = vmin.u32 %v145_v18, %v143_v15  ;;  %v241_v35 = vsel %vm239_vm11, %v240_v28, %v509_v10  ;;  %v166_v16 = vsel %vm81_vm13, %v165_v63, %v495_v55 }
  0x37   :  { %v242_v37 = vadd.s32 %v241_v35, %v237_v57  ;;  %v50_v49 = vmul.f32 %v454_v62, %v48_v39  ;;  %vm183_vm2 = vcmp.le.f32.partialorder %v423_v3, 0.7853982  ;;  %vm171_vm4 = vweird.f32 %v415_v0 }
  0x38   :  { %v147_v30 = vclz %v307_v26  ;;  %v61_v19 = vsub.f32 1.0, %v59_v24  ;;  %v71_v26 = vmul.f32 %v415_v0, %v415_v0  ;;  %vm274_vm9 = vweird.f32 %v417_v1 }
  0x39   :  { %v243_v41 = vadd.s32 536870912, %v242_v37 }
  0x3a   :  { %v308_v34 = vadd.s32 4294967294, %v147_v30  ;;  %v65_v36 = vmul.f32 %v61_v19, %v427_v5  ;;  %v73_v19 = vadd.f32 %v71_v26, %v415_v0 }
  0x3b   :  { %v529_v46 = vshrl.u32 %v243_v41, 30 }
  0x3c   :  { %vm309_vm12 = vcmp.lt.s32.totalorder %v308_v34, 0  ;;  %v67_v12 = vmul.f32 0.70710677, %v65_v36 }
  0x3d   :  { %v150_v40 = vsel %vm309_vm12, 0, %v308_v34  ;;  %v245_v29 = vshll.u32 %v529_v46, 30  ;;  %v268_v36 = vsub.s32 4, %v529_v46 }
  0x3e   :  { %v151_v43 = vsub.s32 32, %v150_v40  ;;  %v152_v44 = vshll.u32 %v143_v15, %v150_v40  ;;  %v155_v45 = vsub.s32 4294967266, %v150_v40  ;;  %v337_v31 = vpop.eup %336  ;;  %v69_v56 = vadd.f32 %v67_v12, %v63_v48 }
  0x3f   :  { %v246_v51 = vsub.s32 %v242_v37, %v245_v29  ;;  %v60_v54 = vmul.f32 %v337_v31, %v50_v49  ;;  %v72_v49 = vmul.f32 %v417_v1, %v417_v1 }
  0x40   :  { %v153_v27 = vshrl.u32 %v135_v38, %v151_v43  ;;  %v156_v47 = vadd.s32 127, %v155_v45  ;;  %338 = vtanh.f32 %v69_v56 }
  0x41   :  { %v248_v53 = vsub.s32 0, %v246_v51  ;;  %v62_v59 = vsub.f32 1.0, %v60_v54 }
  0x42   :  { %v154_v14 = vor.u32 %v153_v27, %v152_v44  ;;  %v157_v50 = vshll.u32 %v156_v47, 23 }
  0x43   :  { %v311_v42 = vmin.u32 %v248_v53, %v246_v51  ;;  %v66_v8 = vmul.f32 %v62_v59, %v430_v6  ;;  %v168_v6 = vsel %vm80_vm14, 0, %v166_v16 }
  0x44   :  { %v158_v52 = vor.u32 4788187, %v157_v50  ;;  %v161_v5 = vcvt.s32.f32 %v154_v14  ;;  %v172_v30 = vand.u32 3, %v168_v6  ;;  %v74_v50 = vadd.f32 %v72_v49, %v417_v1 }
  0x45   :  { %v250_v25 = vclz %v311_v42  ;;  %v68_v21 = vmul.f32 0.70710677, %v66_v8 }
  0x46   :  { %v159_v33 = vand.u32 2147483647, %v158_v52  ;;  %vm177_vm1 = vcmp.eq.s32.totalorder %v172_v30, 2  ;;  %vm174_vm3 = vcmp.eq.s32.totalorder %v172_v30, 0  ;;  %vm173_vm5 = vcmp.lt.s32.totalorder %v172_v30, 2 }
  0x47   :  { %v312_v60 = vadd.s32 4294967294, %v250_v25  ;;  %v70_v57 = vadd.f32 %v68_v21, %v64_v20 }
  0x48   :  { %v162_v58 = vmul.f32 %v161_v5, %v159_v33 }
  0x49   :  { %vm313_vm15 = vcmp.lt.s32.totalorder %v312_v60, 0 }
  0x4a   :  { %v163_v62 = vxor.u32 2147483648, %v162_v58  ;;  %v253_v10 = vsel %vm313_vm15, 0, %v312_v60 }
  0x4b   :  { %v254_v11 = vsub.s32 32, %v253_v10  ;;  %v255_v13 = vshll.u32 %v246_v51, %v253_v10  ;;  %v258_v15 = vsub.s32 4294967266, %v253_v10 }
  0x4c   :  { %v164_v61 = vsel %vm81_vm13, %v163_v62, %v162_v58 }
  0x4d   :  { %v167_v4 = vsel %vm80_vm14, %v415_v0, %v164_v61  ;;  %v256_v17 = vshrl.u32 %v238_v7, %v254_v11  ;;  %v259_v18 = vadd.s32 127, %v258_v15  ;;  %v339_v28 = vpop.eup %338 }
  0x4e   :  { %340 = vcosq.f32 %v167_v4  ;;  %v77_v34 = vmul.f32 %v339_v28, %v415_v0  ;;  %v269_v0 = vsel %vm184_vm0, %v268_v36, %v529_v46 }
  0x4f   :  { %342 = vsinq.f32 %v167_v4  ;;  %v257_v22 = vor.u32 %v256_v17, %v255_v13  ;;  %v260_v9 = vshll.u32 %v259_v18, 23  ;;  %v271_v29 = vsel %vm183_vm2, 0, %v269_v0 }
  0x50   :  { %344 = vtanh.f32 %v70_v57  ;;  %v285_v44 = vadd.f32 %v77_v34, %v73_v19  ;;  %v275_v14 = vand.u32 3, %v271_v29 }
  0x51   :  { %v261_v23 = vor.u32 4788187, %v260_v9  ;;  %v264_v24 = vcvt.s32.f32 %v257_v22 }
  0x52   :  { %vm280_vm6 = vcmp.eq.s32.totalorder %v275_v14, 2  ;;  %vm277_vm7 = vcmp.eq.s32.totalorder %v275_v14, 0  ;;  %vm276_vm8 = vcmp.lt.s32.totalorder %v275_v14, 2 }
  0x53   :  { %v262_v32 = vand.u32 2147483647, %v261_v23 }
  0x55   :  { %v265_v55 = vmul.f32 %v264_v24, %v262_v32 }
  0x57   :  { %v266_v2 = vxor.u32 2147483648, %v265_v55 }
  0x59   :  { %v267_v40 = vsel %vm184_vm0, %v266_v2, %v265_v55 }
  0x5a   :  { %v270_v43 = vsel %vm183_vm2, %v417_v1, %v267_v40 }
  0x5b   :  { %v341_v35 = vpop.eup %340  ;;  %346 = vcosq.f32 %v270_v43 }
  0x5c   :  { %v343_v37 = vpop.eup %342  ;;  %v178_v38 = vxor.u32 2147483648, %v341_v35  ;;  %348 = vsinq.f32 %v270_v43 }
  0x5d   :  { %v175_v39 = vxor.u32 2147483648, %v343_v37  ;;  %v345_v12 = vpop.eup %344 }
  0x5e   :  { %v179_v41 = vsel %vm177_vm1, %v178_v38, %v343_v37  ;;  %v78_v31 = vmul.f32 %v345_v12, %v417_v1 }
  0x5f   :  { %v176_v45 = vsel %vm174_vm3, %v341_v35, %v175_v39 }
  0x60   :  { %v180_v27 = vsel %vm173_vm5, %v176_v45, %v179_v41  ;;  %v286_v53 = vadd.f32 %v78_v31, %v74_v50 }
  0x61   :  { %v181_v47 = vsel %vm171_vm4, nan, %v180_v27 }
  0x62   :  { %v287_v48 = vadd.f32 %v285_v44, %v181_v47 }
  0x64   :  { %289 = vst [vmem:[#allocation5] sm:$0xff] %v287_v48 }
  0x68   :  { %v347_v51 = vpop.eup %346 }
  0x69   :  { %v349_v52 = vpop.eup %348  ;;  %v281_v5 = vxor.u32 2147483648, %v347_v51 }
  0x6a   :  { %v278_v46 = vxor.u32 2147483648, %v349_v52 }
  0x6b   :  { %v282_v3 = vsel %vm280_vm6, %v281_v5, %v349_v52 }
  0x6c   :  { %v279_v54 = vsel %vm277_vm7, %v347_v51, %v278_v46 }
  0x6d   :  { %v283_v56 = vsel %vm276_vm8, %v279_v54, %v282_v3 }
  0x6e   :  { %v284_v33 = vsel %vm274_vm9, nan, %v283_v56 }
  0x6f   :  { %v288_v42 = vadd.f32 %v286_v53, %v284_v33 }
  0x71   :  { %290 = vst [vmem:[#allocation5 + $0x8] sm:$0xff] %v288_v42 }
  0x72   :  { %381 = shalt.err (!%p378_p9)
}
  0x73   :  { %300 = dma.vmem_to_hbm [thread:$0]  %s298_s11, 256, %s578_s1, [#allocation4]  }
  0x74   :  { %392 = dma.done.wait [#allocation4], 256  }
  0x75   :  { %393 = vsyncadd [#allocation4], 4294967040 }
  0x76   :  { %304 = vsyncpa [#allocation3], 1 }
  0x77   :  { %305 = vsyncpa [#allocation4], 1 }

</bundles_post_ra>
